<compile_context>
chip_gen: v7x
topology: tpu7x:2x2x1
jax: 0.10.0
libtpu: 0.0.40
codegen_flags: <defaults>
</compile_context>

<pallas_src>
import jax
import jax.numpy as jnp
from jax.experimental import pallas as pl
from jax.experimental.pallas import tpu as pltpu

_MiB = 1024 * 1024


def _vmem_capacity_bytes():
    try:
        return int(pltpu.get_tpu_info().vmem_capacity_bytes)
    except Exception:
        return 64 * _MiB  # conservative (v7x-sized) fallback


def _make_dma_concat_kernel(n_inputs, lane_widths, dup_width):
    """Pure HBM->HBM DMA concat; appends input-0's first dup_width lanes."""

    def kernel(*refs):
        in_refs = refs[:n_inputs]
        out_ref = refs[n_inputs]
        sem = refs[n_inputs + 1]
        copies = []
        off = 0
        for i, (r, w) in enumerate(zip(in_refs, lane_widths)):
            cp = pltpu.make_async_copy(r, out_ref.at[:, off:off + w], sem.at[i])
            cp.start()
            copies.append(cp)
            off += w
        if dup_width > 0:
            cp = pltpu.make_async_copy(
                in_refs[0].at[:, 0:dup_width],
                out_ref.at[:, off:off + dup_width],
                sem.at[n_inputs])
            cp.start()
            copies.append(cp)
        for cp in copies:
            cp.wait()

    return kernel


def _make_vmem_concat_kernel(lane_widths, dup_width):
    """VMEM-staged concat with in-kernel dtype cast (mixed-dtype fallback)."""

    def kernel(*refs):
        in_refs = refs[:-1]
        o_ref = refs[-1]
        off = 0
        for r, w in zip(in_refs, lane_widths):
            o_ref[:, off:off + w] = r[...].astype(o_ref.dtype)
            off += w
        if dup_width > 0:
            # Re-slice the resident input-0 block; no live slab value is held.
            o_ref[:, off:off + dup_width] = (
                in_refs[0][:, 0:dup_width].astype(o_ref.dtype))

    return kernel


def model_forward(*args):
    """JAX/Pallas equivalent of the PyTorch Model.forward."""
    args = list(args)
    assert len(args) >= 1
    B, C0, H, W = args[0].shape
    for a in args:
        assert a.ndim == 4 and a.shape[0] == B and a.shape[2] == H and a.shape[3] == W, (
            "all inputs must share batch and spatial dims", a.shape)

    out_dtype = jnp.result_type(*[a.dtype for a in args])
    HW = H * W
    size = C0 - 1
    channels = [a.shape[1] for a in args]
    total_c = sum(channels) + size

    lane_widths = [c * HW for c in channels]      # per-input lane extent
    dup_width = size * HW                         # duplicated tail lane extent
    out_lanes = total_c * HW
    n_inputs = len(args)
    itemsize = jnp.dtype(out_dtype).itemsize

    # Lane-major flatten: (B, C, H, W) row-major -> (B, C*HW); contiguous, so
    # XLA lowers it to a bitcast (no data movement).  No wrapper-side astype.
    flats = [a.reshape(B, c * HW) for a, c in zip(args, channels)]

    # Advisory cost hint: pure-bandwidth custom call.
    in_bytes = sum(B * lw * jnp.dtype(a.dtype).itemsize
                   for a, lw in zip(args, lane_widths))
    dup_bytes = B * dup_width * jnp.dtype(args[0].dtype).itemsize
    out_bytes = B * out_lanes * itemsize
    cost = pl.CostEstimate(flops=0, transcendentals=0,
                           bytes_accessed=in_bytes + dup_bytes + out_bytes)

    same_dtype = all(a.dtype == out_dtype for a in args)

    if same_dtype:
        # ---- Fast path: direct HBM->HBM DMA, no VMEM staging, no grid. ----
        kernel = _make_dma_concat_kernel(n_inputs, lane_widths, dup_width)
        out = pl.pallas_call(
            kernel,
            out_shape=jax.ShapeDtypeStruct((B, out_lanes), out_dtype),
            in_specs=[pl.BlockSpec(memory_space=pl.ANY)] * n_inputs,
            out_specs=pl.BlockSpec(memory_space=pl.ANY),
            scratch_shapes=[pltpu.SemaphoreType.DMA((n_inputs + 1,))],
            cost_estimate=cost,
        )(*flats)
        return out.reshape(B, total_c, H, W)

    # ---- Fallback path: mixed dtypes, VMEM-staged with in-kernel cast. ----
    vmem_cap = _vmem_capacity_bytes()
    if vmem_cap >= 96 * _MiB:            # v5e / v6e: 128 MiB physical VMEM
        budget, vmem_limit = 100 * _MiB, 110 * _MiB
    else:                                # v7x: 64 MiB physical VMEM
        budget, vmem_limit = 40 * _MiB, 48 * _MiB

    # Bytes moved per batch row (double-buffered input + output blocks).
    in_row_bytes = sum(lw * jnp.dtype(a.dtype).itemsize
                       for a, lw in zip(args, lane_widths))
    bytes_per_row = in_row_bytes + out_lanes * itemsize
    max_rows = max(1, budget // (2 * bytes_per_row))

    # Sublane pack of the narrowest dtype involved (f32:8, bf16:16, int8:32).
    min_item = min([jnp.dtype(a.dtype).itemsize for a in args] + [itemsize])
    pack = max(8, 32 // min_item)

    if B <= max_rows:
        b_block = B
    else:
        b_block = max(pack, (min(max_rows, B) // pack) * pack)

    # v7x (64 MiB parts, 2 TCs): ensure >=2 grid steps so both cores issue DMA.
    if vmem_cap < 96 * _MiB and B >= 16:
        half = (B + 1) // 2
        half_aligned = ((half + pack - 1) // pack) * pack
        b_block = min(b_block, half_aligned)
    b_block = max(1, min(b_block, B))
    grid_b = pl.cdiv(B, b_block)

    kernel = _make_vmem_concat_kernel(lane_widths, dup_width)
    in_specs = [pl.BlockSpec((b_block, lw), lambda i: (i, 0))
                for lw in lane_widths]
    out_spec = pl.BlockSpec((b_block, out_lanes), lambda i: (i, 0))

    out = pl.pallas_call(
        kernel,
        out_shape=jax.ShapeDtypeStruct((B, out_lanes), out_dtype),
        grid=(grid_b,),
        in_specs=in_specs,
        out_specs=out_spec,
        compiler_params=pltpu.CompilerParams(
            dimension_semantics=("parallel",),
            vmem_limit_bytes=vmem_limit),
        cost_estimate=cost,
    )(*flats)
    return out.reshape(B, total_c, H, W)


def model_forward_ref(*args):
    """Pure-JAX reference mirroring the PyTorch semantics exactly."""
    args = list(args)
    v1 = jnp.concatenate(args, axis=1)
    size = args[0].shape[1] - 1
    v2 = v1[:, 0:9223372036854775807]
    v3 = v2[:, 0:size]
    args.append(v3)
    v4 = jnp.concatenate(args, axis=1)
    return v4


if __name__ == "__main__":
    key = jax.random.PRNGKey(0)
    k1, k2, k3 = jax.random.split(key, 3)

    # Small NCHW inputs consistent with the module's forward(*args).
    x = jax.random.normal(k1, (2, 4, 16, 16), dtype=jnp.float32)
    y = jax.random.normal(k2, (2, 4, 16, 16), dtype=jnp.float32)

    out = jax.block_until_ready(model_forward(x, y))
    ref = model_forward_ref(x, y)
    assert out.shape == ref.shape, (out.shape, ref.shape)
    assert jnp.allclose(out, ref), "Pallas output mismatch vs reference (DMA path)"

    # Mixed-dtype input exercises the in-kernel-cast VMEM fallback path.
    z = jax.random.normal(k3, (2, 3, 16, 16), dtype=jnp.bfloat16)
    out2 = jax.block_until_ready(model_forward(x, z))
    ref2 = model_forward_ref(x, z)
    assert out2.shape == ref2.shape, (out2.shape, ref2.shape)
    assert jnp.allclose(out2, ref2), "Pallas output mismatch vs reference (VMEM path)"

    print("KERNEL_OK")
</pallas_src>

<mosaic_0001>
module attributes {stable_mosaic.version = 11 : i64} {
  func.func @kernel(%arg0: memref<2x1024xf32, #tpu.memory_space<any>>, %arg1: memref<2x1024xf32, #tpu.memory_space<any>>, %arg2: memref<2x2816xf32, #tpu.memory_space<any>>, %arg3: memref<3x!tpu.dma_semaphore, #tpu.memory_space<semaphore_mem>>) attributes {dimension_semantics = [], scalar_prefetch = 0 : i64, scratch_operands = 1 : i64, tpu.core_type = #tpu.core_type<tc>} {
    %c0_i32 = arith.constant 0 : i32
    %c0_i32_0 = arith.constant 0 : i32
    %c0_i32_1 = arith.constant 0 : i32
    %0 = tpu.memref_slice %arg2[%c0_i32_0, %c0_i32_1] : memref<2x2816xf32, #tpu.memory_space<any>> -> memref<2x1024xf32, #tpu.memory_space<any>>
    %1 = tpu.memref_slice %arg3[%c0_i32] : memref<3x!tpu.dma_semaphore, #tpu.memory_space<semaphore_mem>> -> memref<1x!tpu.dma_semaphore, #tpu.memory_space<semaphore_mem>>
    %2 = tpu.memref_squeeze %1 : memref<1x!tpu.dma_semaphore, #tpu.memory_space<semaphore_mem>> -> memref<!tpu.dma_semaphore, #tpu.memory_space<semaphore_mem>>
    tpu.enqueue_dma source(%arg0 : memref<2x1024xf32, #tpu.memory_space<any>>) target(%0 : memref<2x1024xf32, #tpu.memory_space<any>>) target_semaphore(%2 : memref<!tpu.dma_semaphore, #tpu.memory_space<semaphore_mem>>)
    %c1_i32 = arith.constant 1 : i32
    %c0_i32_2 = arith.constant 0 : i32
    %c1024_i32 = arith.constant 1024 : i32
    %3 = tpu.memref_slice %arg2[%c0_i32_2, %c1024_i32] : memref<2x2816xf32, #tpu.memory_space<any>> -> memref<2x1024xf32, #tpu.memory_space<any>>
    %4 = tpu.memref_slice %arg3[%c1_i32] : memref<3x!tpu.dma_semaphore, #tpu.memory_space<semaphore_mem>> -> memref<1x!tpu.dma_semaphore, #tpu.memory_space<semaphore_mem>>
    %5 = tpu.memref_squeeze %4 : memref<1x!tpu.dma_semaphore, #tpu.memory_space<semaphore_mem>> -> memref<!tpu.dma_semaphore, #tpu.memory_space<semaphore_mem>>
    tpu.enqueue_dma source(%arg1 : memref<2x1024xf32, #tpu.memory_space<any>>) target(%3 : memref<2x1024xf32, #tpu.memory_space<any>>) target_semaphore(%5 : memref<!tpu.dma_semaphore, #tpu.memory_space<semaphore_mem>>)
    %c2_i32 = arith.constant 2 : i32
    %c0_i32_3 = arith.constant 0 : i32
    %c0_i32_4 = arith.constant 0 : i32
    %6 = tpu.memref_slice %arg0[%c0_i32_3, %c0_i32_4] : memref<2x1024xf32, #tpu.memory_space<any>> -> memref<2x768xf32, #tpu.memory_space<any>>
    %c0_i32_5 = arith.constant 0 : i32
    %c2048_i32 = arith.constant 2048 : i32
    %7 = tpu.memref_slice %arg2[%c0_i32_5, %c2048_i32] : memref<2x2816xf32, #tpu.memory_space<any>> -> memref<2x768xf32, #tpu.memory_space<any>>
    %8 = tpu.memref_slice %arg3[%c2_i32] : memref<3x!tpu.dma_semaphore, #tpu.memory_space<semaphore_mem>> -> memref<1x!tpu.dma_semaphore, #tpu.memory_space<semaphore_mem>>
    %9 = tpu.memref_squeeze %8 : memref<1x!tpu.dma_semaphore, #tpu.memory_space<semaphore_mem>> -> memref<!tpu.dma_semaphore, #tpu.memory_space<semaphore_mem>>
    tpu.enqueue_dma source(%6 : memref<2x768xf32, #tpu.memory_space<any>>) target(%7 : memref<2x768xf32, #tpu.memory_space<any>>) target_semaphore(%9 : memref<!tpu.dma_semaphore, #tpu.memory_space<semaphore_mem>>)
    %c0_i32_6 = arith.constant 0 : i32
    %c0_i32_7 = arith.constant 0 : i32
    %c0_i32_8 = arith.constant 0 : i32
    %10 = tpu.memref_slice %arg2[%c0_i32_7, %c0_i32_8] : memref<2x2816xf32, #tpu.memory_space<any>> -> memref<2x1024xf32, #tpu.memory_space<any>>
    %11 = tpu.memref_slice %arg3[%c0_i32_6] : memref<3x!tpu.dma_semaphore, #tpu.memory_space<semaphore_mem>> -> memref<1x!tpu.dma_semaphore, #tpu.memory_space<semaphore_mem>>
    %12 = tpu.memref_squeeze %11 : memref<1x!tpu.dma_semaphore, #tpu.memory_space<semaphore_mem>> -> memref<!tpu.dma_semaphore, #tpu.memory_space<semaphore_mem>>
    tpu.wait_dma2 semaphore(%12 : memref<!tpu.dma_semaphore, #tpu.memory_space<semaphore_mem>>) src(%arg0 : memref<2x1024xf32, #tpu.memory_space<any>>) dst(%10 : memref<2x1024xf32, #tpu.memory_space<any>>)
    %c1_i32_9 = arith.constant 1 : i32
    %c0_i32_10 = arith.constant 0 : i32
    %c1024_i32_11 = arith.constant 1024 : i32
    %13 = tpu.memref_slice %arg2[%c0_i32_10, %c1024_i32_11] : memref<2x2816xf32, #tpu.memory_space<any>> -> memref<2x1024xf32, #tpu.memory_space<any>>
    %14 = tpu.memref_slice %arg3[%c1_i32_9] : memref<3x!tpu.dma_semaphore, #tpu.memory_space<semaphore_mem>> -> memref<1x!tpu.dma_semaphore, #tpu.memory_space<semaphore_mem>>
    %15 = tpu.memref_squeeze %14 : memref<1x!tpu.dma_semaphore, #tpu.memory_space<semaphore_mem>> -> memref<!tpu.dma_semaphore, #tpu.memory_space<semaphore_mem>>
    tpu.wait_dma2 semaphore(%15 : memref<!tpu.dma_semaphore, #tpu.memory_space<semaphore_mem>>) src(%arg1 : memref<2x1024xf32, #tpu.memory_space<any>>) dst(%13 : memref<2x1024xf32, #tpu.memory_space<any>>)
    %c2_i32_12 = arith.constant 2 : i32
    %c0_i32_13 = arith.constant 0 : i32
    %c0_i32_14 = arith.constant 0 : i32
    %16 = tpu.memref_slice %arg0[%c0_i32_13, %c0_i32_14] : memref<2x1024xf32, #tpu.memory_space<any>> -> memref<2x768xf32, #tpu.memory_space<any>>
    %c0_i32_15 = arith.constant 0 : i32
    %c2048_i32_16 = arith.constant 2048 : i32
    %17 = tpu.memref_slice %arg2[%c0_i32_15, %c2048_i32_16] : memref<2x2816xf32, #tpu.memory_space<any>> -> memref<2x768xf32, #tpu.memory_space<any>>
    %18 = tpu.memref_slice %arg3[%c2_i32_12] : memref<3x!tpu.dma_semaphore, #tpu.memory_space<semaphore_mem>> -> memref<1x!tpu.dma_semaphore, #tpu.memory_space<semaphore_mem>>
    %19 = tpu.memref_squeeze %18 : memref<1x!tpu.dma_semaphore, #tpu.memory_space<semaphore_mem>> -> memref<!tpu.dma_semaphore, #tpu.memory_space<semaphore_mem>>
    tpu.wait_dma2 semaphore(%19 : memref<!tpu.dma_semaphore, #tpu.memory_space<semaphore_mem>>) src(%16 : memref<2x768xf32, #tpu.memory_space<any>>) dst(%17 : memref<2x768xf32, #tpu.memory_space<any>>)
    return
  }
}

</mosaic_0001>

<bundles_post_ra>
// kernel: tpu_custom_call.1
= control target key start
LH: loop header
LB: loop body
LE: loop exit
PB: predicated region body
PF: predicated region fallthrough
CT: control target
= control target key end

     0   :  { %s95_s12 = smov [#allocation2]   ;;  %s96_s13 = smov [#allocation3]   ;;  %s135_s0 = inlined_call_operand.hbm [shape: f32[2,1024], index: 0, kind: input, shape index: {}]   ;;  %s136_s2 = inlined_call_operand.hbm [shape: f32[2,2816], index: 2, kind: output, shape index: {}]   ;;  %s137_s1 = inlined_call_operand.hbm [shape: f32[2,1024], index: 1, kind: input, shape index: {}]  }
   0x1   :  { %s20_s11 = scalar_lea.hbm %s136_s2, 256  ;;  %s97_s14 = smov 0  }
   0x2   :  { %19 = dma.general %s135_s0, 256, %s136_s2, %s95_s12, %s96_s13, [#allocation4], %s97_s14, 0  }
   0x3   :  { %s35_s21 = scalar_lea.hbm %s136_s2, 512  ;;  %s98_s22 = smov [#allocation2 + $0x1]  }
   0x4   :  { %s99_s23 = smov [#allocation5]   ;;  %s100_s26 = smov [#allocation2 + $0x2]  }
   0x5   :  { %34 = dma.general %s137_s1, 256, %s20_s11, %s98_s22, %s99_s23, [#allocation6], %s97_s14, 0  }
   0x6   :  { %s101_s27 = smov [#allocation7]  }
   0x7   :  { %49 = dma.general %s135_s0, 192, %s35_s21, %s100_s26, %s101_s27, [#allocation8], %s97_s14, 0  }
   0x8   :  { %89 = dma.done.wait [#allocation2], 256 }
   0x9   :  { %90 = vsyncadd [#allocation2], 4294967040 }
   0xa   :  { %91 = dma.done.wait [#allocation2 + $0x1], 256 }
   0xb   :  { %92 = vsyncadd [#allocation2 + $0x1], 4294967040 }
   0xc   :  { %93 = dma.done.wait [#allocation2 + $0x2], 192 }
   0xd   :  { %94 = vsyncadd [#allocation2 + $0x2], 4294967104 }
   0xe   :  { %59 = vsyncmov [#allocation2] }
  0x11   :  { %s60_s2 = vpop.sfrf %59 }
  0x12   :  { %p79_p0 = scmp.ne.s32.totalorder %s60_s2, 0 }
  0x14   :  { %64 = shalt.err (%p79_p0)  }
  0x15   :  { %66 = vsyncmov [#allocation2 + $0x1] }
  0x18   :  { %s67_s30 = vpop.sfrf %66 }
  0x19   :  { %p80_p1 = scmp.ne.s32.totalorder %s67_s30, 0 }
  0x1b   :  { %71 = shalt.err (%p80_p1)  }
  0x1c   :  { %73 = vsyncmov [#allocation2 + $0x2] }
  0x1f   :  { %s74_s1 = vpop.sfrf %73 }
  0x20   :  { %p81_p2 = scmp.ne.s32.totalorder %s74_s1, 0 }
  0x22   :  { %78 = shalt.err (%p81_p2)  }

</bundles_post_ra>
